<compile_context>
chip_gen: v7x
topology: tpu7x:2x2x1
jax: 0.10.0
libtpu: 0.0.40
codegen_flags: <defaults>
</compile_context>

<pallas_src>
import functools
import math

import jax
import jax.numpy as jnp
from jax import lax
from jax.experimental import pallas as pl
from jax.experimental.pallas import tpu as pltpu

_TILE_ROWS = 256        # rows per block (x 512 lanes x 4 B = 512 KiB f32 tile)


def _threefry2x32(c0, c1, k0, k1, rounds=8):
    """Counter-based PRNG round function (add/xor/rotate only: portable)."""
    def rotl(v, r):
        return (v << jnp.uint32(r)) | (v >> jnp.uint32(32 - r))

    k2 = k0 ^ k1 ^ jnp.uint32(0x1BD11BDA)
    ks = (k0, k1, k2)
    rots = (13, 15, 26, 6, 17, 29, 16, 24)

    x0 = c0 + k0
    x1 = c1 + k1
    for r in range(rounds):
        x0 = x0 + x1
        x1 = rotl(x1, rots[r % 8])
        x1 = x1 ^ x0
        if (r + 1) % 4 == 0:
            inj = (r + 1) // 4
            x0 = x0 + ks[inj % 3]
            x1 = x1 + ks[(inj + 1) % 3] + jnp.uint32(inj)
    return x0, x1


def _gaussian_dropout_kernel(seed_ref, x_ref, o_ref, *, std):
    """o = x * (1 + std * z), z ~ N(0,1) generated in-kernel per element."""
    tm, tn = x_ref.shape
    half = tm // 2
    tile = pl.program_id(0)

    # Per-element counters, unique across the whole array and across tiles:
    # stateless => identical results regardless of grid order / which core
    # runs the tile (safe with dimension_semantics=("parallel",)).
    row = lax.broadcasted_iota(jnp.int32, (half, tn), 0)
    col = lax.broadcasted_iota(jnp.int32, (half, tn), 1)
    c0 = lax.bitcast_convert_type(row + tile * half, jnp.uint32)
    c1 = lax.bitcast_convert_type(col, jnp.uint32)

    # Key = user seed (splat + bitcast avoids signed/unsigned converts).
    k0 = lax.bitcast_convert_type(
        jnp.full((half, tn), seed_ref[0], dtype=jnp.int32), jnp.uint32)
    k1 = jnp.uint32(0x9E3779B9)

    b0, b1 = _threefry2x32(c0, c1, k0, k1)

    # Mantissa trick: (bits >> 9) | 0x3F800000 bitcasts to a float32 in [1, 2).
    f0 = lax.bitcast_convert_type(
        (b0 >> jnp.uint32(9)) | jnp.uint32(0x3F800000), jnp.float32)
    f1 = lax.bitcast_convert_type(
        (b1 >> jnp.uint32(9)) | jnp.uint32(0x3F800000), jnp.float32)
    u1 = jnp.float32(2.0) - f0          # (0, 1]  -> log-safe
    u2 = f1 - jnp.float32(1.0)          # [0, 1)

    # Box-Muller using BOTH outputs: cos for the top half rows, sin for the
    # bottom half -> one log/sqrt/cos/sin per 2 output elements.
    r = jnp.sqrt(jnp.float32(-2.0) * jnp.log(u1))
    theta = jnp.float32(2.0 * math.pi) * u2
    z = jnp.concatenate([r * jnp.cos(theta), r * jnp.sin(theta)], axis=0)

    eps = jnp.float32(1.0) + jnp.float32(std) * z
    o_ref[...] = (x_ref[...].astype(jnp.float32) * eps).astype(o_ref.dtype)


def gaussian_dropout(x, prob: float, seed: int, training: bool = True):
    """Pallas implementation of GaussianDropout.forward (multiplicative noise)."""
    if not training:
        return x

    # Mirror the PyTorch module exactly: prob is the ctor arg, the p/(1-p)
    # transform is applied twice (self.prob then std).
    q = prob / (1.0 - prob)
    assert 0.0 <= q < 1.0
    std = (q / (1.0 - q)) ** 0.5

    orig_shape = x.shape
    orig_dtype = x.dtype
    total = x.size

    # Lane-dense slab: prefer wide rows (512 lanes) and zero padding.
    # TODO(synk): handle a ragged tail with a masked final tile (pltpu.store
    # with a lane mask) instead of jnp.pad + slice for odd element counts.
    lanes = 128
    pad = (-total) % (2 * lanes)
    for cand in (512, 256, 128):
        if total % (2 * cand) == 0:
            lanes = cand
            pad = 0
            break

    xf = x.reshape(-1)
    if pad:
        xf = jnp.pad(xf, (0, pad))
    rows = xf.size // lanes          # guaranteed even
    x2 = xf.reshape(rows, lanes)

    tile_rows = min(rows, _TILE_ROWS)          # even; 8-aligned or == full dim
    grid = (pl.cdiv(rows, tile_rows),)

    seed_arr = jnp.asarray([seed], dtype=jnp.int32)

    out2 = pl.pallas_call(
        functools.partial(_gaussian_dropout_kernel, std=float(std)),
        out_shape=jax.ShapeDtypeStruct((rows, lanes), orig_dtype),
        grid_spec=pltpu.PrefetchScalarGridSpec(
            num_scalar_prefetch=1,
            grid=grid,
            in_specs=[pl.BlockSpec((tile_rows, lanes), lambda i, seed: (i, 0))],
            out_specs=pl.BlockSpec((tile_rows, lanes), lambda i, seed: (i, 0)),
        ),
        compiler_params=pltpu.CompilerParams(
            dimension_semantics=("parallel",)),
    )(seed_arr, x2)

    out_flat = out2.reshape(-1)
    if pad:
        out_flat = out_flat[:total]
    return out_flat.reshape(orig_shape)


if __name__ == "__main__":
    key = jax.random.PRNGKey(0)
    prob = 0.1  # module constructor argument

    # Small NCHW input consistent with the UNet usage: (batch, channels, H, W)
    x = jax.random.normal(key, (2, 4, 16, 16), dtype=jnp.float32)

    y_train = jax.block_until_ready(
        gaussian_dropout(x, prob, seed=1234, training=True))
    y_eval = jax.block_until_ready(
        gaussian_dropout(x, prob, seed=1234, training=False))

    assert y_train.shape == x.shape and y_train.dtype == x.dtype
    assert bool(jnp.all(jnp.isfinite(y_train)))
    assert bool(jnp.all(y_eval == x))

    # Noise statistics: on a ones input the output IS eps ~ N(1, std).
    ones = jnp.ones((2, 4, 16, 16), dtype=jnp.float32)
    eps = jax.block_until_ready(
        gaussian_dropout(ones, prob, seed=7, training=True))
    q = prob / (1.0 - prob)
    expected_std = (q / (1.0 - q)) ** 0.5
    assert abs(float(jnp.mean(eps)) - 1.0) < 0.1
    assert abs(float(jnp.std(eps)) - expected_std) < 0.1

    # Multi-tile path (grid > 1) + determinism for a larger activation.
    xl = jax.random.normal(jax.random.PRNGKey(1), (2, 4, 128, 256),
                           dtype=jnp.float32)
    yl_a = jax.block_until_ready(gaussian_dropout(xl, prob, seed=42, training=True))
    yl_b = jax.block_until_ready(gaussian_dropout(xl, prob, seed=42, training=True))
    assert yl_a.shape == xl.shape
    assert bool(jnp.all(jnp.isfinite(yl_a)))
    assert bool(jnp.all(yl_a == yl_b))

    print("KERNEL_OK")
</pallas_src>

<mosaic_0001>
module attributes {stable_mosaic.version = 11 : i64} {
  func.func @_gaussian_dropout_kernel(%arg0: i32, %arg1: memref<1xi32, #tpu.memory_space<smem>>, %arg2: memref<4x512xf32, #tpu.memory_space<vmem>>, %arg3: memref<4x512xf32, #tpu.memory_space<vmem>>) attributes {dimension_semantics = [#tpu.dimension_semantics<parallel>], iteration_bounds = array<i64: 1>, scalar_prefetch = 1 : i64, scratch_operands = 0 : i64, tpu.core_type = #tpu.core_type<tc>, window_params = [{transform_indices = @transform_0, window_bounds = array<i64: 4, 512>}, {transform_indices = @transform_1, window_bounds = array<i64: 4, 512>}]} {
    %0 = tpu.iota {dimensions = array<i32: 0>} : vector<2x512xi32>
    %1 = tpu.iota {dimensions = array<i32: 1>} : vector<2x512xi32>
    %c2_i32 = arith.constant 2 : i32
    %2 = arith.muli %arg0, %c2_i32 : i32
    %3 = vector.broadcast %2 : i32 to vector<2x512xi32>
    %4 = arith.addi %0, %3 : vector<2x512xi32>
    %5 = tpu.bitcast %4 : vector<2x512xi32> -> vector<2x512xi32>
    %6 = tpu.bitcast %1 : vector<2x512xi32> -> vector<2x512xi32>
    %c0 = arith.constant 0 : index
    %7 = memref.load %arg1[%c0] : memref<1xi32, #tpu.memory_space<smem>>
    %8 = vector.broadcast %7 : i32 to vector<2x512xi32>
    %9 = tpu.bitcast %8 : vector<2x512xi32> -> vector<2x512xi32>
    %c-1640531527_i32 = arith.constant -1640531527 : i32
    %10 = vector.broadcast %c-1640531527_i32 : i32 to vector<2x512xi32>
    %11 = arith.xori %9, %10 : vector<2x512xi32>
    %c466688986_i32 = arith.constant 466688986 : i32
    %12 = vector.broadcast %c466688986_i32 : i32 to vector<2x512xi32>
    %13 = arith.xori %11, %12 : vector<2x512xi32>
    %14 = arith.addi %5, %9 : vector<2x512xi32>
    %c-1640531527_i32_0 = arith.constant -1640531527 : i32
    %15 = vector.broadcast %c-1640531527_i32_0 : i32 to vector<2x512xi32>
    %16 = arith.addi %6, %15 : vector<2x512xi32>
    %17 = arith.addi %14, %16 : vector<2x512xi32>
    %c13_i32 = arith.constant 13 : i32
    %18 = vector.broadcast %c13_i32 : i32 to vector<2x512xi32>
    %19 = arith.shli %16, %18 : vector<2x512xi32>
    %c19_i32 = arith.constant 19 : i32
    %20 = vector.broadcast %c19_i32 : i32 to vector<2x512xi32>
    %21 = arith.shrui %16, %20 : vector<2x512xi32>
    %22 = arith.ori %19, %21 : vector<2x512xi32>
    %23 = arith.xori %22, %17 : vector<2x512xi32>
    %24 = arith.addi %17, %23 : vector<2x512xi32>
    %c15_i32 = arith.constant 15 : i32
    %25 = vector.broadcast %c15_i32 : i32 to vector<2x512xi32>
    %26 = arith.shli %23, %25 : vector<2x512xi32>
    %c17_i32 = arith.constant 17 : i32
    %27 = vector.broadcast %c17_i32 : i32 to vector<2x512xi32>
    %28 = arith.shrui %23, %27 : vector<2x512xi32>
    %29 = arith.ori %26, %28 : vector<2x512xi32>
    %30 = arith.xori %29, %24 : vector<2x512xi32>
    %31 = arith.addi %24, %30 : vector<2x512xi32>
    %c26_i32 = arith.constant 26 : i32
    %32 = vector.broadcast %c26_i32 : i32 to vector<2x512xi32>
    %33 = arith.shli %30, %32 : vector<2x512xi32>
    %c6_i32 = arith.constant 6 : i32
    %34 = vector.broadcast %c6_i32 : i32 to vector<2x512xi32>
    %35 = arith.shrui %30, %34 : vector<2x512xi32>
    %36 = arith.ori %33, %35 : vector<2x512xi32>
    %37 = arith.xori %36, %31 : vector<2x512xi32>
    %38 = arith.addi %31, %37 : vector<2x512xi32>
    %c6_i32_1 = arith.constant 6 : i32
    %39 = vector.broadcast %c6_i32_1 : i32 to vector<2x512xi32>
    %40 = arith.shli %37, %39 : vector<2x512xi32>
    %c26_i32_2 = arith.constant 26 : i32
    %41 = vector.broadcast %c26_i32_2 : i32 to vector<2x512xi32>
    %42 = arith.shrui %37, %41 : vector<2x512xi32>
    %43 = arith.ori %40, %42 : vector<2x512xi32>
    %44 = arith.xori %43, %38 : vector<2x512xi32>
    %c-1640531527_i32_3 = arith.constant -1640531527 : i32
    %45 = vector.broadcast %c-1640531527_i32_3 : i32 to vector<2x512xi32>
    %46 = arith.addi %38, %45 : vector<2x512xi32>
    %47 = arith.addi %44, %13 : vector<2x512xi32>
    %c1_i32 = arith.constant 1 : i32
    %48 = vector.broadcast %c1_i32 : i32 to vector<2x512xi32>
    %49 = arith.addi %47, %48 : vector<2x512xi32>
    %50 = arith.addi %46, %49 : vector<2x512xi32>
    %c17_i32_4 = arith.constant 17 : i32
    %51 = vector.broadcast %c17_i32_4 : i32 to vector<2x512xi32>
    %52 = arith.shli %49, %51 : vector<2x512xi32>
    %c15_i32_5 = arith.constant 15 : i32
    %53 = vector.broadcast %c15_i32_5 : i32 to vector<2x512xi32>
    %54 = arith.shrui %49, %53 : vector<2x512xi32>
    %55 = arith.ori %52, %54 : vector<2x512xi32>
    %56 = arith.xori %55, %50 : vector<2x512xi32>
    %57 = arith.addi %50, %56 : vector<2x512xi32>
    %c29_i32 = arith.constant 29 : i32
    %58 = vector.broadcast %c29_i32 : i32 to vector<2x512xi32>
    %59 = arith.shli %56, %58 : vector<2x512xi32>
    %c3_i32 = arith.constant 3 : i32
    %60 = vector.broadcast %c3_i32 : i32 to vector<2x512xi32>
    %61 = arith.shrui %56, %60 : vector<2x512xi32>
    %62 = arith.ori %59, %61 : vector<2x512xi32>
    %63 = arith.xori %62, %57 : vector<2x512xi32>
    %64 = arith.addi %57, %63 : vector<2x512xi32>
    %c16_i32 = arith.constant 16 : i32
    %65 = vector.broadcast %c16_i32 : i32 to vector<2x512xi32>
    %66 = arith.shli %63, %65 : vector<2x512xi32>
    %c16_i32_6 = arith.constant 16 : i32
    %67 = vector.broadcast %c16_i32_6 : i32 to vector<2x512xi32>
    %68 = arith.shrui %63, %67 : vector<2x512xi32>
    %69 = arith.ori %66, %68 : vector<2x512xi32>
    %70 = arith.xori %69, %64 : vector<2x512xi32>
    %71 = arith.addi %64, %70 : vector<2x512xi32>
    %c24_i32 = arith.constant 24 : i32
    %72 = vector.broadcast %c24_i32 : i32 to vector<2x512xi32>
    %73 = arith.shli %70, %72 : vector<2x512xi32>
    %c8_i32 = arith.constant 8 : i32
    %74 = vector.broadcast %c8_i32 : i32 to vector<2x512xi32>
    %75 = arith.shrui %70, %74 : vector<2x512xi32>
    %76 = arith.ori %73, %75 : vector<2x512xi32>
    %77 = arith.xori %76, %71 : vector<2x512xi32>
    %78 = arith.addi %71, %13 : vector<2x512xi32>
    %79 = arith.addi %77, %9 : vector<2x512xi32>
    %c2_i32_7 = arith.constant 2 : i32
    %80 = vector.broadcast %c2_i32_7 : i32 to vector<2x512xi32>
    %81 = arith.addi %79, %80 : vector<2x512xi32>
    %c9_i32 = arith.constant 9 : i32
    %82 = vector.broadcast %c9_i32 : i32 to vector<2x512xi32>
    %83 = arith.shrui %78, %82 : vector<2x512xi32>
    %c1065353216_i32 = arith.constant 1065353216 : i32
    %84 = vector.broadcast %c1065353216_i32 : i32 to vector<2x512xi32>
    %85 = arith.ori %83, %84 : vector<2x512xi32>
    %86 = tpu.bitcast %85 : vector<2x512xi32> -> vector<2x512xf32>
    %c9_i32_8 = arith.constant 9 : i32
    %87 = vector.broadcast %c9_i32_8 : i32 to vector<2x512xi32>
    %88 = arith.shrui %81, %87 : vector<2x512xi32>
    %c1065353216_i32_9 = arith.constant 1065353216 : i32
    %89 = vector.broadcast %c1065353216_i32_9 : i32 to vector<2x512xi32>
    %90 = arith.ori %88, %89 : vector<2x512xi32>
    %91 = tpu.bitcast %90 : vector<2x512xi32> -> vector<2x512xf32>
    %cst = arith.constant 2.000000e+00 : f32
    %92 = vector.broadcast %cst : f32 to vector<2x512xf32>
    %93 = arith.subf %92, %86 : vector<2x512xf32>
    %cst_10 = arith.constant 1.000000e+00 : f32
    %94 = vector.broadcast %cst_10 : f32 to vector<2x512xf32>
    %95 = arith.subf %91, %94 : vector<2x512xf32>
    %96 = math.log %93 : vector<2x512xf32>
    %cst_11 = arith.constant -2.000000e+00 : f32
    %97 = vector.broadcast %cst_11 : f32 to vector<2x512xf32>
    %98 = arith.mulf %97, %96 : vector<2x512xf32>
    %99 = math.sqrt %98 : vector<2x512xf32>
    %cst_12 = arith.constant 6.28318548 : f32
    %100 = vector.broadcast %cst_12 : f32 to vector<2x512xf32>
    %101 = arith.mulf %100, %95 : vector<2x512xf32>
    %102 = math.cos %101 : vector<2x512xf32>
    %103 = arith.mulf %99, %102 : vector<2x512xf32>
    %104 = math.sin %101 : vector<2x512xf32>
    %105 = arith.mulf %99, %104 : vector<2x512xf32>
    %106 = tpu.concatenate %103, %105 in 0 : vector<2x512xf32>, vector<2x512xf32> -> vector<4x512xf32>
    %cst_13 = arith.constant 0.353553385 : f32
    %107 = vector.broadcast %cst_13 : f32 to vector<4x512xf32>
    %108 = arith.mulf %107, %106 : vector<4x512xf32>
    %cst_14 = arith.constant 1.000000e+00 : f32
    %109 = vector.broadcast %cst_14 : f32 to vector<4x512xf32>
    %110 = arith.addf %109, %108 : vector<4x512xf32>
    %c0_15 = arith.constant 0 : index
    %c0_16 = arith.constant 0 : index
    %111 = vector.load %arg2[%c0_15, %c0_16] : memref<4x512xf32, #tpu.memory_space<vmem>>, vector<4x512xf32>
    %112 = arith.mulf %111, %110 : vector<4x512xf32>
    %c0_17 = arith.constant 0 : index
    %c0_18 = arith.constant 0 : index
    %113 = vector.load %arg3[%c0_17, %c0_18] : memref<4x512xf32, #tpu.memory_space<vmem>>, vector<4x512xf32>
    tpu.vector_store %arg3[%c0_17, %c0_18], %112 {strides = array<i32>} : memref<4x512xf32, #tpu.memory_space<vmem>>, vector<4x512xf32>,
    return
  }
  func.func @transform_0(%arg0: i32, %arg1: memref<1xi32, #tpu.memory_space<smem>>) -> (i32, i32) {
    %c0_i32 = arith.constant 0 : i32
    %c0_i32_0 = arith.constant 0 : i32
    return %arg0, %c0_i32 : i32, i32
  }
  func.func @transform_1(%arg0: i32, %arg1: memref<1xi32, #tpu.memory_space<smem>>) -> (i32, i32) {
    %c0_i32 = arith.constant 0 : i32
    %c0_i32_0 = arith.constant 0 : i32
    return %arg0, %c0_i32 : i32, i32
  }
}

</mosaic_0001>

<bundles_post_ra>
// kernel: tpu_custom_call.1
= control target key start
LH: loop header
LB: loop body
LE: loop exit
PB: predicated region body
PF: predicated region fallthrough
CT: control target
= control target key end

     0   :  { %8 = vsyncpa [#allocation5], 0  ;;  %s1818_s0 = inlined_call_operand.<no memory space> [shape: s32[1], index: 0, kind: input, shape index: {}]   ;;  %s1819_s1 = inlined_call_operand.hbm [shape: f32[4,512], index: 1, kind: input, shape index: {}]   ;;  %s1820_s2 = inlined_call_operand.hbm [shape: f32[4,512], index: 2, kind: output, shape index: {}]  }
   0x1   :  { %9 = vsyncpa [#allocation6], 0  ;;  %s1332_s9 = smov [#allocation4]   ;;  %s1284_s13 = scalar_lea.hbm %s1819_s1, 256 }
   0x2   :  { %s16_s10 = sshll.u32 %s1332_s9, 4  ;;  %p1285_p0 = scmp.ne.s32.totalorder %s1819_s1, %s1284_s13  ;;  %s17_s10 = int_to_ptr.vmem [resolvable:$true] %s16_s10 }
   0x3   :  { %p1288_p1 = scmp.lt.u32.totalorder %s1284_s13, %s1819_s1 }
   0x5   :  { %p1290_p2 = pnand %p1288_p1, %p1285_p0 }
   0x7   :  { %1293 = shalt.err (!%p1290_p2)
}
   0x8   :  { %s1294_s18 = scalar_lea.vmem %s17_s10, 256  ;;  %p1299_p4 = scmp.lt.s32.totalorder %s17_s10, %s17_s10 }
   0x9   :  { %p1295_p3 = scmp.ne.s32.totalorder %s17_s10, %s1294_s18  ;;  %p1300_p5 = scmp.lt.s32.totalorder %s1294_s18, %s1294_s18 }
   0xb   :  { %p1301_p6 = por %p1300_p5, %p1299_p4 }
   0xd   :  { %p1302_p7 = pnand %p1301_p6, %p1295_p3 }
   0xf   :  { %1305 = shalt.err (!%p1302_p7)
}
  0x10   :  { %19 = dma.hbm_to_vmem [thread:$0]  %s1819_s1, 256, %s17_s10, [#allocation5]  }
  0x11   :  { %1328 = dma.done.wait [#allocation5], 256  }
  0x12   :  { %1329 = vsyncadd [#allocation5], 4294967040  ;;  %v23_v0 = vlaneseq  ;;  %v1370_v1 = vstv %s1818_s0  ;;  %s1339_s0 = smov [#allocation7]  }
  0x13   :  { %s1183_s1 = sshll.u32 %s1339_s0, 4  ;;  %s1184_s1 = int_to_ptr.vmem [resolvable:$true] %s1183_s1 }
  0x14   :  { %v24_v2 = vshrl.u32 %v23_v0, 7  ;;  %v26_v3 = vand.u32 127, %v23_v0  ;;  %s1306_s23 = scalar_lea.vmem %s1184_s1, 256  ;;  %p1311_p9 = scmp.lt.s32.totalorder %s1184_s1, %s1184_s1 }
  0x15   :  { %p1307_p8 = scmp.ne.s32.totalorder %s1184_s1, %s1306_s23  ;;  %p1312_p10 = scmp.lt.s32.totalorder %s1306_s23, %s1306_s23 }
  0x16   :  { %v27_v4 = vadd.s32 128, %v26_v3  ;;  %v28_v5 = vadd.s32 256, %v26_v3  ;;  %v29_v6 = vadd.s32 384, %v26_v3  ;;  %v37_v7 = vadd.s32 %v1370_v1, %v24_v2 }
  0x17   :  { %v38_v8 = vadd.s32 2654435769, %v26_v3  ;;  %p1313_p11 = por %p1312_p10, %p1311_p9 }
  0x18   :  { %v39_v9 = vadd.s32 2654435769, %v27_v4  ;;  %v40_v10 = vadd.s32 2654435769, %v28_v5  ;;  %v41_v11 = vadd.s32 2654435769, %v29_v6 }
  0x19   :  { %v46_v12 = vshll.u32 %v38_v8, 13  ;;  %v50_v13 = vshrl.u32 %v38_v8, 19  ;;  %v42_v14 = vadd.s32 %v38_v8, %v37_v7  ;;  %v35_v6 = vxor.u32 2654435769, %v1370_v1  ;;  %p1314_p12 = pnand %p1313_p11, %p1307_p8 }
  0x1a   :  { %v43_v15 = vadd.s32 %v39_v9, %v37_v7  ;;  %v44_v16 = vadd.s32 %v40_v10, %v37_v7  ;;  %v47_v17 = vshll.u32 %v39_v9, 13  ;;  %v48_v18 = vshll.u32 %v40_v10, 13 }
  0x1b   :  { %v49_v19 = vshll.u32 %v41_v11, 13  ;;  %v51_v20 = vshrl.u32 %v39_v9, 19  ;;  %v52_v21 = vshrl.u32 %v40_v10, 19  ;;  %v45_v22 = vadd.s32 %v41_v11, %v37_v7 }
  0x1c   :  { %v53_v23 = vshrl.u32 %v41_v11, 19  ;;  %v54_v24 = vor.u32 %v50_v13, %v46_v12 }
  0x1d   :  { %v55_v25 = vor.u32 %v51_v20, %v47_v17  ;;  %v56_v26 = vor.u32 %v52_v21, %v48_v18  ;;  %v1374_v20 = vxor.u32 466688986, %v35_v6 }
  0x1e   :  { %v57_v27 = vor.u32 %v53_v23, %v49_v19  ;;  %v58_v28 = vxor.u32 %v54_v24, %v42_v14 }
  0x1f   :  { %v59_v29 = vxor.u32 %v55_v25, %v43_v15  ;;  %v60_v30 = vxor.u32 %v56_v26, %v44_v16 }
  0x20   :  { %v61_v31 = vxor.u32 %v57_v27, %v45_v22  ;;  %v66_v32 = vshll.u32 %v58_v28, 15  ;;  %v70_v33 = vshrl.u32 %v58_v28, 17  ;;  %v62_v34 = vadd.s32 %v58_v28, %v42_v14 }
  0x21   :  { %v63_v35 = vadd.s32 %v59_v29, %v43_v15  ;;  %v67_v36 = vshll.u32 %v59_v29, 15  ;;  %v68_v37 = vshll.u32 %v60_v30, 15  ;;  %v64_v38 = vadd.s32 %v60_v30, %v44_v16 }
  0x22   :  { %v69_v39 = vshll.u32 %v61_v31, 15  ;;  %v71_v40 = vshrl.u32 %v59_v29, 17  ;;  %v72_v41 = vshrl.u32 %v60_v30, 17  ;;  %v65_v42 = vadd.s32 %v61_v31, %v45_v22 }
  0x23   :  { %v73_v43 = vshrl.u32 %v61_v31, 17  ;;  %v74_v44 = vor.u32 %v70_v33, %v66_v32 }
  0x24   :  { %v75_v45 = vor.u32 %v71_v40, %v67_v36  ;;  %v76_v46 = vor.u32 %v72_v41, %v68_v37 }
  0x25   :  { %v77_v47 = vor.u32 %v73_v43, %v69_v39  ;;  %v78_v48 = vxor.u32 %v74_v44, %v62_v34 }
  0x26   :  { %v79_v49 = vxor.u32 %v75_v45, %v63_v35  ;;  %v80_v50 = vxor.u32 %v76_v46, %v64_v38 }
  0x27   :  { %v81_v51 = vxor.u32 %v77_v47, %v65_v42  ;;  %v86_v52 = vshll.u32 %v78_v48, 26  ;;  %v90_v53 = vshrl.u32 %v78_v48, 6  ;;  %v82_v54 = vadd.s32 %v78_v48, %v62_v34 }
  0x28   :  { %v83_v55 = vadd.s32 %v79_v49, %v63_v35  ;;  %v87_v56 = vshll.u32 %v79_v49, 26  ;;  %v88_v57 = vshll.u32 %v80_v50, 26  ;;  %v84_v58 = vadd.s32 %v80_v50, %v64_v38 }
  0x29   :  { %v89_v59 = vshll.u32 %v81_v51, 26  ;;  %v91_v60 = vshrl.u32 %v79_v49, 6  ;;  %v92_v61 = vshrl.u32 %v80_v50, 6  ;;  %v85_v62 = vadd.s32 %v81_v51, %v65_v42 }
  0x2a   :  { %v93_v63 = vshrl.u32 %v81_v51, 6  ;;  %v94_v0 = vor.u32 %v90_v53, %v86_v52 }
  0x2b   :  { %v95_v2 = vor.u32 %v91_v60, %v87_v56  ;;  %v96_v3 = vor.u32 %v92_v61, %v88_v57 }
  0x2c   :  { %v97_v4 = vor.u32 %v93_v63, %v89_v59  ;;  %v98_v5 = vxor.u32 %v94_v0, %v82_v54 }
  0x2d   :  { %v99_v7 = vxor.u32 %v95_v2, %v83_v55  ;;  %v100_v8 = vxor.u32 %v96_v3, %v84_v58 }
  0x2e   :  { %v101_v9 = vxor.u32 %v97_v4, %v85_v62  ;;  %v106_v10 = vshll.u32 %v98_v5, 6  ;;  %v110_v11 = vshrl.u32 %v98_v5, 26  ;;  %v102_v12 = vadd.s32 %v98_v5, %v82_v54 }
  0x2f   :  { %v103_v13 = vadd.s32 %v99_v7, %v83_v55  ;;  %v107_v14 = vshll.u32 %v99_v7, 6  ;;  %v108_v15 = vshll.u32 %v100_v8, 6  ;;  %v104_v16 = vadd.s32 %v100_v8, %v84_v58 }
  0x30   :  { %v109_v17 = vshll.u32 %v101_v9, 6  ;;  %v111_v18 = vshrl.u32 %v99_v7, 26  ;;  %v112_v19 = vshrl.u32 %v100_v8, 26  ;;  %v105_v21 = vadd.s32 %v101_v9, %v85_v62 }
  0x31   :  { %v113_v22 = vshrl.u32 %v101_v9, 26  ;;  %v114_v23 = vor.u32 %v110_v11, %v106_v10  ;;  %v122_v32 = vadd.s32 2654435769, %v102_v12  ;;  %v123_v33 = vadd.s32 2654435769, %v103_v13 }
  0x32   :  { %v115_v24 = vor.u32 %v111_v18, %v107_v14  ;;  %v116_v25 = vor.u32 %v112_v19, %v108_v15  ;;  %v124_v36 = vadd.s32 2654435769, %v104_v16  ;;  %v125_v39 = vadd.s32 2654435769, %v105_v21 }
  0x33   :  { %v117_v26 = vor.u32 %v113_v22, %v109_v17  ;;  %v118_v27 = vxor.u32 %v114_v23, %v102_v12 }
  0x34   :  { %v119_v28 = vxor.u32 %v115_v24, %v103_v13  ;;  %v120_v29 = vxor.u32 %v116_v25, %v104_v16 }
  0x35   :  { %v121_v30 = vxor.u32 %v117_v26, %v105_v21  ;;  %v126_v31 = vadd.s32 %v118_v27, %v1374_v20 }
  0x36   :  { %v127_v34 = vadd.s32 %v119_v28, %v1374_v20  ;;  %v128_v35 = vadd.s32 %v120_v29, %v1374_v20 }
  0x37   :  { %v129_v37 = vadd.s32 %v121_v30, %v1374_v20  ;;  %v130_v38 = vadd.s32 1, %v126_v31 }
  0x38   :  { %v131_v40 = vadd.s32 1, %v127_v34  ;;  %v132_v41 = vadd.s32 1, %v128_v35 }
  0x39   :  { %v133_v42 = vadd.s32 1, %v129_v37  ;;  %v138_v43 = vshll.u32 %v130_v38, 17  ;;  %v142_v44 = vshrl.u32 %v130_v38, 15  ;;  %v134_v45 = vadd.s32 %v130_v38, %v122_v32 }
  0x3a   :  { %v135_v46 = vadd.s32 %v131_v40, %v123_v33  ;;  %v139_v47 = vshll.u32 %v131_v40, 17  ;;  %v140_v48 = vshll.u32 %v132_v41, 17  ;;  %v136_v49 = vadd.s32 %v132_v41, %v124_v36 }
  0x3b   :  { %v141_v50 = vshll.u32 %v133_v42, 17  ;;  %v143_v51 = vshrl.u32 %v131_v40, 15  ;;  %v144_v52 = vshrl.u32 %v132_v41, 15  ;;  %v137_v53 = vadd.s32 %v133_v42, %v125_v39 }
  0x3c   :  { %v145_v54 = vshrl.u32 %v133_v42, 15  ;;  %v146_v55 = vor.u32 %v142_v44, %v138_v43 }
  0x3d   :  { %v147_v56 = vor.u32 %v143_v51, %v139_v47  ;;  %v148_v57 = vor.u32 %v144_v52, %v140_v48 }
  0x3e   :  { %v149_v58 = vor.u32 %v145_v54, %v141_v50  ;;  %v150_v59 = vxor.u32 %v146_v55, %v134_v45 }
  0x3f   :  { %v151_v60 = vxor.u32 %v147_v56, %v135_v46  ;;  %v152_v61 = vxor.u32 %v148_v57, %v136_v49 }
  0x40   :  { %v153_v62 = vxor.u32 %v149_v58, %v137_v53  ;;  %v158_v63 = vshll.u32 %v150_v59, 29  ;;  %v162_v0 = vshrl.u32 %v150_v59, 3  ;;  %v154_v2 = vadd.s32 %v150_v59, %v134_v45 }
  0x41   :  { %v155_v3 = vadd.s32 %v151_v60, %v135_v46  ;;  %v159_v4 = vshll.u32 %v151_v60, 29  ;;  %v160_v5 = vshll.u32 %v152_v61, 29  ;;  %v156_v6 = vadd.s32 %v152_v61, %v136_v49 }
  0x42   :  { %v161_v7 = vshll.u32 %v153_v62, 29  ;;  %v163_v8 = vshrl.u32 %v151_v60, 3  ;;  %v164_v9 = vshrl.u32 %v152_v61, 3  ;;  %v157_v10 = vadd.s32 %v153_v62, %v137_v53 }
  0x43   :  { %v165_v11 = vshrl.u32 %v153_v62, 3  ;;  %v166_v12 = vor.u32 %v162_v0, %v158_v63 }
  0x44   :  { %v167_v13 = vor.u32 %v163_v8, %v159_v4  ;;  %v168_v14 = vor.u32 %v164_v9, %v160_v5 }
  0x45   :  { %v169_v15 = vor.u32 %v165_v11, %v161_v7  ;;  %v170_v16 = vxor.u32 %v166_v12, %v154_v2 }
  0x46   :  { %v171_v17 = vxor.u32 %v167_v13, %v155_v3  ;;  %v172_v18 = vxor.u32 %v168_v14, %v156_v6 }
  0x47   :  { %v173_v19 = vxor.u32 %v169_v15, %v157_v10  ;;  %v178_v21 = vshll.u32 %v170_v16, 16  ;;  %v182_v22 = vshrl.u32 %v170_v16, 16  ;;  %v174_v23 = vadd.s32 %v170_v16, %v154_v2 }
  0x48   :  { %v179_v24 = vshll.u32 %v171_v17, 16  ;;  %v180_v25 = vshll.u32 %v172_v18, 16  ;;  %v175_v26 = vadd.s32 %v171_v17, %v155_v3  ;;  %v176_v27 = vadd.s32 %v172_v18, %v156_v6 }
  0x49   :  { %v183_v28 = vshrl.u32 %v171_v17, 16  ;;  %v184_v29 = vshrl.u32 %v172_v18, 16  ;;  %v186_v30 = vor.u32 %v182_v22, %v178_v21  ;;  %v181_v31 = vshll.u32 %v173_v19, 16 }
  0x4a   :  { %v185_v32 = vshrl.u32 %v173_v19, 16  ;;  %v177_v38 = vadd.s32 %v173_v19, %v157_v10 }
  0x4b   :  { %v187_v33 = vor.u32 %v183_v28, %v179_v24  ;;  %v188_v34 = vor.u32 %v184_v29, %v180_v25  ;;  %v190_v35 = vxor.u32 %v186_v30, %v174_v23 }
  0x4c   :  { %v189_v41 = vor.u32 %v185_v32, %v181_v31 }
  0x4d   :  { %v191_v36 = vxor.u32 %v187_v33, %v175_v26  ;;  %v192_v37 = vxor.u32 %v188_v34, %v176_v27  ;;  %v198_v39 = vshll.u32 %v190_v35, 24  ;;  %v202_v40 = vshrl.u32 %v190_v35, 8 }
  0x4e   :  { %v194_v42 = vadd.s32 %v190_v35, %v174_v23  ;;  %v193_v54 = vxor.u32 %v189_v41, %v177_v38 }
  0x4f   :  { %v199_v43 = vshll.u32 %v191_v36, 24  ;;  %v200_v44 = vshll.u32 %v192_v37, 24  ;;  %v195_v45 = vadd.s32 %v191_v36, %v175_v26  ;;  %v203_v46 = vshrl.u32 %v191_v36, 8 }
  0x50   :  { %v204_v47 = vshrl.u32 %v192_v37, 8  ;;  %v206_v48 = vor.u32 %v202_v40, %v198_v39  ;;  %v214_v49 = vadd.s32 %v194_v42, %v1374_v20  ;;  %v196_v50 = vadd.s32 %v192_v37, %v176_v27 }
  0x51   :  { %v207_v51 = vor.u32 %v203_v46, %v199_v43  ;;  %v215_v53 = vadd.s32 %v195_v45, %v1374_v20  ;;  %v201_v62 = vshll.u32 %v193_v54, 24  ;;  %v205_v63 = vshrl.u32 %v193_v54, 8 }
  0x52   :  { %v208_v52 = vor.u32 %v204_v47, %v200_v44  ;;  %v210_v55 = vxor.u32 %v206_v48, %v194_v42  ;;  %v226_v58 = vshrl.u32 %v214_v49, 9  ;;  %v197_v8 = vadd.s32 %v193_v54, %v177_v38 }
  0x53   :  { %v211_v56 = vxor.u32 %v207_v51, %v195_v45  ;;  %v227_v61 = vshrl.u32 %v215_v53, 9  ;;  %v209_v9 = vor.u32 %v205_v63, %v201_v62  ;;  %v216_v26 = vadd.s32 %v196_v50, %v1374_v20 }
  0x54   :  { %v218_v57 = vadd.s32 %v210_v55, %v1370_v1  ;;  %v212_v59 = vxor.u32 %v208_v52, %v196_v50  ;;  %v230_v3 = vor.u32 1065353216, %v226_v58  ;;  %v1395_v32 = vadd.s32 %v197_v8, %v1374_v20 }
  0x55   :  { %v219_v60 = vadd.s32 %v211_v56, %v1370_v1  ;;  %v231_v6 = vor.u32 1065353216, %v227_v61  ;;  %v213_v16 = vxor.u32 %v209_v9, %v197_v8  ;;  %v228_v33 = vshrl.u32 %v216_v26, 9 }
  0x56   :  { %v222_v0 = vadd.s32 2, %v218_v57  ;;  %v220_v5 = vadd.s32 %v212_v59, %v1370_v1  ;;  %v250_v12 = vsub.f32 2.0, %v230_v3  ;;  %v229_v41 = vshrl.u32 %v1395_v32, 9 }
  0x57   :  { %v223_v2 = vadd.s32 2, %v219_v60  ;;  %v251_v15 = vsub.f32 2.0, %v231_v6  ;;  %v221_v22 = vadd.s32 %v213_v16, %v1370_v1  ;;  %v1401_v42 = vor.u32 1065353216, %v228_v33 }
  0x58   :  { %v238_v4 = vshrl.u32 %v222_v0, 9  ;;  %v224_v14 = vadd.s32 2, %v220_v5  ;;  %1252 = vlog2.f32 %v250_v12  ;;  %v1333_v50 = vmov 683565275  }
  0x59   :  { %v239_v7 = vshrl.u32 %v223_v2, 9  ;;  %1254 = vlog2.f32 %v251_v15  ;;  %v225_v28 = vadd.s32 2, %v221_v22  ;;  %v1334_v52 = vmov 2475754826  }
  0x5a   :  { %v242_v10 = vor.u32 1065353216, %v238_v4  ;;  %v240_v21 = vshrl.u32 %v224_v14, 9  ;;  %v1335_v55 = vmov 2131351028   ;;  %v1336_v57 = vmov 2102212464  }
  0x5b   :  { %v243_v11 = vor.u32 1065353216, %v239_v7  ;;  %v241_v1 = vshrl.u32 %v225_v28, 9  ;;  %v1337_v63 = vmov 920167782   ;;  %v1338_v4 = vmov 1326507024  }
  0x5c   :  { %v1192_v13 = vadd.f32 -1.0, %v242_v10  ;;  %v244_v27 = vor.u32 1065353216, %v240_v21 }
  0x5d   :  { %v1193_v17 = vadd.f32 -1.0, %v243_v11  ;;  %v1405_v44 = vor.u32 1065353216, %v241_v1 }
  0x5e   :  { %v1385_v18 = vmul.f32 6.2831855, %v1192_v13  ;;  %v1194_v34 = vadd.f32 -1.0, %v244_v27 }
  0x5f   :  { %v1389_v23 = vmul.f32 6.2831855, %v1193_v17 }
  0x60   :  { %v305_v19 = vand.u32 2139095040, %v1385_v18  ;;  %v302_v30 = vand.u32 2147483647, %v1385_v18  ;;  %v1403_v43 = vmul.f32 6.2831855, %v1194_v34  ;;  %vm304_vm13 = vcmp.lt.s32.totalorder %v1385_v18, 0 }
  0x61   :  { %v408_v29 = vand.u32 2139095040, %v1389_v23  ;;  %v405_v40 = vand.u32 2147483647, %v1389_v23 }
  0x62   :  { %v306_v24 = vshrl.u32 %v305_v19, 23  ;;  %v1253_v35 = vpop.eup %1252  ;;  %v309_v38 = vand.u32 8388607, %v302_v30  ;;  %v511_v16 = vand.u32 2139095040, %v1403_v43 }
  0x63   :  { %v409_v36 = vshrl.u32 %v408_v29, 23  ;;  %v1255_v37 = vpop.eup %1254  ;;  %v259_v45 = vmul.f32 0.6931472, %v1253_v35  ;;  %v412_v59 = vand.u32 8388607, %v405_v40 }
  0x64   :  { %v1196_v25 = vadd.s32 4294967169, %v306_v24  ;;  %v261_v46 = vmul.f32 0.6931472, %v1255_v37  ;;  %v310_v48 = vor.u32 8388608, %v309_v38 }
  0x65   :  { %v1200_v47 = vadd.s32 4294967169, %v409_v36  ;;  %v1417_v2 = vmul.f32 -2.0, %v259_v45  ;;  %v413_v13 = vor.u32 8388608, %v412_v59 }
  0x66   :  { %v312_v31 = vadd.s32 1, %v1196_v25  ;;  %v1421_v7 = vmul.f32 -2.0, %v261_v46  ;;  %v350_v15 = vshll.u32 %v310_v48, 8 }
  0x67   :  { %v415_v6 = vadd.s32 1, %v1200_v47  ;;  %1256 = vrsqrt.f32 %v1417_v2  ;;  %v1433_v26 = vshll.u32 %v413_v13, 8  ;;  %vm272_vm14 = vcmp.eq.f32.partialorder %v1417_v2, inf }
  0x68   :  { %vm313_vm0 = vcmp.gt.s32.totalorder %v312_v31, 0  ;;  %1258 = vrsqrt.f32 %v1421_v7 }
  0x69   :  { %v314_v39 = vsel %vm313_vm0, %v312_v31, 0  ;;  %vm416_vm4 = vcmp.gt.s32.totalorder %v415_v6, 0  ;;  %v512_v31 = vshrl.u32 %v511_v16, 23 }
  0x6a   :  { %v316_v20 = vand.u32 31, %v314_v39  ;;  %v315_v54 = vshrl.u32 %v314_v39, 5  ;;  %v417_v29 = vsel %vm416_vm4, %v415_v6, 0 }
  0x6b   :  { %v419_v1 = vand.u32 31, %v417_v29  ;;  %v418_v39 = vshrl.u32 %v417_v29, 5 }
  0x6c   :  { %v317_v49 = vsub.s32 32, %v316_v20  ;;  %v319_v51 = vshll.u32 %v1333_v50, %v316_v20  ;;  %v322_v53 = vshll.u32 %v1334_v52, %v316_v20  ;;  %v325_v56 = vshll.u32 %v1335_v55, %v316_v20 }
  0x6d   :  { %v328_v58 = vshll.u32 %v1336_v57, %v316_v20  ;;  %v331_v0 = vshll.u32 %v1337_v63, %v316_v20  ;;  %vm334_vm1 = vcmp.lt.s32.totalorder %v315_v54, 1  ;;  %vm337_vm2 = vcmp.lt.s32.totalorder %v315_v54, 4 }
  0x6e   :  { %v320_v60 = vshrl.u32 %v1334_v52, %v317_v49  ;;  %v323_v61 = vshrl.u32 %v1335_v55, %v317_v49  ;;  %v326_v62 = vshrl.u32 %v1336_v57, %v317_v49  ;;  %v329_v3 = vshrl.u32 %v1337_v63, %v317_v49 }
  0x6f   :  { %v332_v5 = vshrl.u32 %v1338_v4, %v317_v49  ;;  %v318_v8 = vshrl.u32 %v1333_v50, %v317_v49  ;;  %vm336_vm3 = vcmp.lt.s32.totalorder %v315_v54, 3  ;;  %vm335_vm5 = vcmp.lt.s32.totalorder %v315_v54, 2 }
  0x70   :  { %v321_v9 = vor.u32 %v320_v60, %v319_v51  ;;  %v324_v10 = vor.u32 %v323_v61, %v322_v53  ;;  %v327_v11 = vor.u32 %v326_v62, %v325_v56  ;;  %v330_v12 = vor.u32 %v329_v3, %v328_v58 }
  0x71   :  { %v333_v14 = vor.u32 %v332_v5, %v331_v0  ;;  %v420_v46 = vsub.s32 32, %v419_v1  ;;  %v422_v47 = vshll.u32 %v1333_v50, %v419_v1  ;;  %v425_v48 = vshll.u32 %v1334_v52, %v419_v1  ;;  %v1257_v3 = vpop.eup %1256 }
  0x72   :  { %v339_v17 = vsel %vm337_vm2, %v327_v11, 2102212464  ;;  %v338_v19 = vsel %vm334_vm1, %v318_v8, %v321_v9  ;;  %v342_v22 = vsel %vm334_vm1, %v321_v9, %v324_v10  ;;  %v343_v24 = vsel %vm337_vm2, %v330_v12, 920167782 }
  0x73   :  { %v340_v21 = vsel %vm336_vm3, %v324_v10, %v339_v17  ;;  %v346_v25 = vsel %vm334_vm1, %v324_v10, %v327_v11  ;;  %v344_v27 = vsel %vm336_vm3, %v327_v11, %v343_v24  ;;  %v347_v28 = vsel %vm337_vm2, %v333_v14, 1326507024 }
  0x74   :  { %v341_v33 = vsel %vm335_vm5, %v338_v19, %v340_v21  ;;  %v345_v34 = vsel %vm335_vm5, %v342_v22, %v344_v27  ;;  %v348_v35 = vsel %vm336_vm3, %v330_v12, %v347_v28  ;;  %v428_v49 = vshll.u32 %v1335_v55, %v419_v1  ;;  %v1259_v12 = vpop.eup %1258 }
  0x75   :  { %v349_v36 = vsel %vm335_vm5, %v346_v25, %v348_v35  ;;  %v1441_v37 = vmul.u32.u64.low %v350_v15, %v345_v34  ;;  %v1442_v38 = vmul.u32.u64.high %v350_v15, %v345_v34, %v1441_v37  ;;  %v431_v51 = vshll.u32 %v1336_v57, %v419_v1 }
  0x76   :  { %v1445_v20 = vmul.u32.u64.low %v350_v15, %v349_v36  ;;  %v1446_v45 = vmul.u32.u64.high %v350_v15, %v349_v36, %v1445_v20  ;;  %v434_v53 = vshll.u32 %v1337_v63, %v419_v1  ;;  %v357_v54 = vmul.u32 %v350_v15, %v341_v33 }
  0x77   :  { %v423_v56 = vshrl.u32 %v1334_v52, %v420_v46  ;;  %v426_v58 = vshrl.u32 %v1335_v55, %v420_v46  ;;  %v429_v59 = vshrl.u32 %v1336_v57, %v420_v46  ;;  %v360_v60 = vadd.s32 1, %v1442_v38 }
  0x78   :  { %v421_v61 = vshrl.u32 %v1333_v50, %v420_v46  ;;  %v432_v62 = vshrl.u32 %v1337_v63, %v420_v46  ;;  %v435_v0 = vshrl.u32 %v1338_v4, %v420_v46  ;;  %vm359_vm6 = vc.u32 %v1446_v45, %v1441_v37 }
  0x79   :  { %v424_v5 = vor.u32 %v423_v56, %v422_v47  ;;  %v427_v6 = vor.u32 %v426_v58, %v425_v48  ;;  %vm437_vm7 = vcmp.lt.s32.totalorder %v418_v39, 1  ;;  %v361_v8 = vsel %vm359_vm6, %v360_v60, %v1442_v38 }
  0x7a   :  { %v430_v9 = vor.u32 %v429_v59, %v428_v49  ;;  %v433_v10 = vor.u32 %v432_v62, %v431_v51  ;;  %v436_v11 = vor.u32 %v435_v0, %v434_v53  ;;  %v362_v13 = vadd.s32 %v361_v8, %v357_v54 }
  0x7b   :  { %vm438_vm8 = vcmp.lt.s32.totalorder %v418_v39, 2  ;;  %vm439_vm9 = vcmp.lt.s32.totalorder %v418_v39, 3  ;;  %vm440_vm10 = vcmp.lt.s32.totalorder %v418_v39, 4  ;;  %v445_v15 = vsel %vm437_vm7, %v424_v5, %v427_v6 }
  0x7c   :  { %v442_v14 = vsel %vm440_vm10, %v430_v9, 2102212464  ;;  %v446_v16 = vsel %vm440_vm10, %v433_v10, 920167782  ;;  %v1204_v17 = vadd.s32 4294967169, %v512_v31  ;;  %v363_v19 = vadd.s32 536870912, %v362_v13 }
  0x7d   :  { %v447_v21 = vsel %vm439_vm9, %v430_v9, %v446_v16  ;;  %v449_v22 = vsel %vm437_vm7, %v427_v6, %v430_v9  ;;  %v508_v24 = vand.u32 2147483647, %v1403_v43  ;;  %v441_v25 = vsel %vm437_vm7, %v421_v61, %v424_v5 }
  0x7e   :  { %v443_v27 = vsel %vm439_vm9, %v427_v6, %v442_v14  ;;  %v448_v28 = vsel %vm438_vm8, %v445_v15, %v447_v21  ;;  %v450_v29 = vsel %vm440_vm10, %v436_v11, 1326507024  ;;  %v1468_v33 = vshrl.u32 %v363_v19, 30 }
  0x7f   :  { %v451_v34 = vsel %vm439_vm9, %v433_v10, %v450_v29  ;;  %v1471_v35 = vmul.u32.u64.low %v1433_v26, %v448_v28  ;;  %v1472_v1 = vmul.u32.u64.high %v1433_v26, %v448_v28, %v1471_v35  ;;  %v252_v31 = vsub.f32 2.0, %v1401_v42 }
  0x80   :  { %v1195_v36 = vadd.f32 -1.0, %v1405_v44  ;;  %v452_v38 = vsel %vm438_vm8, %v449_v22, %v451_v34  ;;  %v518_v20 = vadd.s32 1, %v1204_v17  ;;  %v365_v46 = vshll.u32 %v1468_v33, 30 }
  0x81   :  { %v444_v47 = vsel %vm438_vm8, %v441_v25, %v443_v27  ;;  %v1481_v48 = vmul.u32.u64.low %v1433_v26, %v452_v38  ;;  %v1482_v49 = vmul.u32.u64.high %v1433_v26, %v452_v38, %v1481_v48  ;;  %v515_v51 = vand.u32 8388607, %v508_v24 }
  0x82   :  { %vm519_vm11 = vcmp.gt.s32.totalorder %v518_v20, 0  ;;  %v1488_v42 = vor.u32 1065353216, %v229_v41  ;;  %v1490_v44 = vsub.s32 %v362_v13, %v365_v46  ;;  %v463_v53 = vadd.s32 1, %v1472_v1 }
  0x83   :  { %v520_v54 = vsel %vm519_vm11, %v518_v20, 0  ;;  %1260 = vlog2.f32 %v252_v31  ;;  %v1493_v39 = vmul.f32 6.2831855, %v1195_v36  ;;  %v460_v56 = vmul.u32 %v1433_v26, %v444_v47 }
  0x84   :  { %v522_v58 = vand.u32 31, %v520_v54  ;;  %v275_v59 = vand.u32 2147483648, %v1417_v2  ;;  %v282_v60 = vand.u32 2147483648, %v1421_v7  ;;  %v368_v61 = vsub.s32 0, %v1490_v44 }
  0x85   :  { %vm462_vm12 = vc.u32 %v1482_v49, %v1471_v35  ;;  %v1502_v32 = vmul.f32 %v1257_v3, %v1417_v2  ;;  %v516_v62 = vor.u32 8388608, %v515_v51  ;;  %v1506_v5 = vmul.f32 %v1259_v12, %v1421_v7 }
  0x86   :  { %v464_v41 = vsel %vm462_vm12, %v463_v53, %v1472_v1  ;;  %v523_v0 = vsub.s32 32, %v522_v58  ;;  %v1197_v26 = vmin.u32 %v368_v61, %v1490_v44  ;;  %v1509_v6 = vshrl.u32 %v520_v54, 5 }
  0x87   :  { %v525_v8 = vshll.u32 %v1333_v50, %v522_v58  ;;  %v465_v9 = vadd.s32 %v464_v41, %v460_v56  ;;  %v528_v11 = vshll.u32 %v1334_v52, %v522_v58  ;;  %v531_v14 = vshll.u32 %v1335_v55, %v522_v58 }
  0x88   :  { %v526_v10 = vshrl.u32 %v1334_v52, %v523_v0  ;;  %v529_v3 = vshrl.u32 %v1335_v55, %v523_v0  ;;  %v370_v13 = vclz %v1197_v26  ;;  %v532_v15 = vshrl.u32 %v1336_v57, %v523_v0 }
  0x89   :  { %v534_v12 = vshll.u32 %v1336_v57, %v522_v58  ;;  %v358_v16 = vadd.s32 %v1441_v37, %v1446_v45  ;;  %v466_v17 = vadd.s32 536870912, %v465_v9  ;;  %v535_v19 = vshrl.u32 %v1337_v63, %v523_v0 }
  0x8a   :  { %v1521_v21 = vshll.u32 %v516_v62, 8  ;;  %v1198_v22 = vadd.s32 4294967294, %v370_v13  ;;  %v388_v25 = vsub.s32 4, %v1468_v33  ;;  %v537_v27 = vshll.u32 %v1337_v63, %v522_v58 }
  0x8b   :  { %v538_v28 = vshrl.u32 %v1338_v4, %v523_v0  ;;  %v1527_v29 = vshrl.u32 %v466_v17, 30  ;;  %v524_v34 = vshrl.u32 %v1333_v50, %v523_v0  ;;  %v527_v1 = vor.u32 %v526_v10, %v525_v8 }
  0x8c   :  { %v530_v37 = vor.u32 %v529_v3, %v528_v11  ;;  %vm1199_vm15 = vcmp.lt.s32.totalorder %v1198_v22, 0  ;;  %v533_v45 = vor.u32 %v532_v15, %v531_v14  ;;  %v536_v31 = vor.u32 %v535_v19, %v534_v12 }
  0x8d   :  { %vm540_vm0 = vcmp.lt.s32.totalorder %v1509_v6, 1  ;;  %v1532_v36 = vpop.eup %1260  ;;  %vm279_vm1 = vcmp.eq.f32.partialorder %v1421_v7, inf  ;;  %v373_v38 = vsel %vm1199_vm15, 0, %v1198_v22  ;;  %v468_v20 = vshll.u32 %v1527_v29, 30 }
  0x8e   :  { %v539_v46 = vor.u32 %v538_v28, %v537_v27  ;;  %vm543_vm2 = vcmp.lt.s32.totalorder %v1509_v6, 4  ;;  %v374_v47 = vsub.s32 32, %v373_v38  ;;  %v375_v48 = vshll.u32 %v1490_v44, %v373_v38 }
  0x8f   :  { %v378_v51 = vsub.s32 4294967266, %v373_v38  ;;  %v545_v53 = vsel %vm543_vm2, %v533_v45, 2102212464  ;;  %vm1542_vm3 = vcmp.le.f32.partialorder %v302_v30, 0.7853982  ;;  %v1546_v56 = vsub.s32 %v465_v9, %v468_v20 }
  0x90   :  { %vm541_vm4 = vcmp.lt.s32.totalorder %v1509_v6, 2  ;;  %vm542_vm5 = vcmp.lt.s32.totalorder %v1509_v6, 3  ;;  %v614_v58 = vand.u32 2139095040, %v1493_v39  ;;  %v376_v61 = vshrl.u32 %v358_v16, %v374_v47 }
  0x91   :  { %v379_v44 = vadd.s32 127, %v378_v51  ;;  %v544_v41 = vsel %vm540_vm0, %v524_v34, %v527_v1  ;;  %v546_v62 = vsel %vm542_vm5, %v530_v37, %v545_v53  ;;  %vm407_vm6 = vcmp.lt.s32.totalorder %v1389_v23, 0 }
  0x92   :  { %v471_v30 = vsub.s32 0, %v1546_v56  ;;  %v548_v0 = vsel %vm540_vm0, %v527_v1, %v530_v37  ;;  %v549_v26 = vsel %vm543_vm2, %v536_v31, 920167782  ;;  %v552_v8 = vsel %vm540_vm0, %v530_v37, %v533_v45 }
  0x93   :  { %v377_v9 = vor.u32 %v376_v61, %v375_v48  ;;  %v380_v10 = vshll.u32 %v379_v44, 23  ;;  %v550_v11 = vsel %vm542_vm5, %v533_v45, %v549_v26  ;;  %v553_v3 = vsel %vm543_vm2, %v539_v46, 1326507024 }
  0x94   :  { %v389_v13 = vsel %vm304_vm13, %v388_v25, %v1468_v33  ;;  %v1201_v14 = vmin.u32 %v471_v30, %v1546_v56  ;;  %v547_v15 = vsel %vm541_vm4, %v544_v41, %v546_v62  ;;  %v615_v12 = vshrl.u32 %v614_v58, 23 }
  0x95   :  { %vm274_vm7 = vcmp.eq.f32.partialorder %v1417_v2, 0.0  ;;  %v381_v16 = vor.u32 4788187, %v380_v10  ;;  %v384_v17 = vcvt.s32.f32 %v377_v9  ;;  %v551_v19 = vsel %vm541_vm4, %v548_v0, %v550_v11 }
  0x96   :  { %v554_v22 = vsel %vm542_vm5, %v536_v31, %v553_v3  ;;  %vm281_vm8 = vcmp.eq.f32.partialorder %v1421_v7, 0.0  ;;  %v473_v27 = vclz %v1201_v14  ;;  %v491_v1 = vsub.s32 4, %v1527_v29 }
  0x97   :  { %v555_v33 = vsel %vm541_vm4, %v552_v8, %v554_v22  ;;  %v1582_v25 = vmul.u32.u64.low %v1521_v21, %v551_v19  ;;  %v1583_v28 = vmul.u32.u64.high %v1521_v21, %v551_v19, %v1582_v25  ;;  %v382_v34 = vand.u32 2147483647, %v381_v16 }
  0x98   :  { %v1588_v37 = vmul.u32.u64.low %v1521_v21, %v555_v33  ;;  %v1589_v45 = vmul.u32.u64.high %v1521_v21, %v555_v33, %v1588_v37  ;;  %v273_v31 = vsel %vm272_vm14, %v1417_v2, %v1502_v32  ;;  %vm1597_vm9 = vcmp.le.f32.partialorder %v405_v40, 0.7853982 }
  0x99   :  { %v1202_v38 = vadd.s32 4294967294, %v473_v27  ;;  %v611_v20 = vand.u32 2147483647, %v1493_v39  ;;  %v1208_v46 = vadd.s32 4294967169, %v615_v12  ;;  %v280_v47 = vsel %vm279_vm1, %v1421_v7, %v1506_v5 }
  0x9a   :  { %v385_v48 = vmul.f32 %v384_v17, %v382_v34  ;;  %v391_v51 = vsel %vm1542_vm3, 0, %v389_v13  ;;  %v563_v32 = vmul.u32 %v1521_v21, %v547_v15  ;;  %v461_v40 = vadd.s32 %v1471_v35, %v1482_v49 }
  0x9b   :  { %vm1203_vm10 = vcmp.lt.s32.totalorder %v1202_v38, 0  ;;  %v566_v53 = vadd.s32 1, %v1583_v28  ;;  %v621_v58 = vadd.s32 1, %v1208_v46  ;;  %v492_v41 = vsel %vm407_vm6, %v491_v1, %v1527_v29 }
  0x9c   :  { %v386_v61 = vxor.u32 2147483648, %v385_v48  ;;  %v476_v44 = vsel %vm1203_vm10, 0, %v1202_v38  ;;  %vm565_vm11 = vc.u32 %v1589_v45, %v1582_v25  ;;  %v618_v0 = vand.u32 8388607, %v611_v20 }
  0x9d   :  { %v477_v5 = vsub.s32 32, %v476_v44  ;;  %v478_v62 = vshll.u32 %v1546_v56, %v476_v44  ;;  %v481_v21 = vsub.s32 4294967266, %v476_v44  ;;  %v567_v30 = vsel %vm565_vm11, %v566_v53, %v1583_v28 }
  0x9e   :  { %v387_v35 = vsel %vm304_vm13, %v386_v61, %v385_v48  ;;  %v568_v49 = vadd.s32 %v567_v30, %v563_v32  ;;  %vm622_vm12 = vcmp.gt.s32.totalorder %v621_v58, 0  ;;  %v1626_v56 = vand.u32 3, %v391_v51 }
  0x9f   :  { %v390_v29 = vsel %vm1542_vm3, %v1385_v18, %v387_v35  ;;  %v479_v26 = vshrl.u32 %v461_v40, %v477_v5  ;;  %v482_v8 = vadd.s32 127, %v481_v21  ;;  %v623_v9 = vsel %vm622_vm12, %v621_v58, 0 }
  0xa0   :  { %1262 = vcosq.f32 %v390_v29  ;;  %v569_v10 = vadd.s32 536870912, %v568_v49  ;;  %v625_v11 = vand.u32 31, %v623_v9  ;;  %v1632_v3 = vsel %vm274_vm7, %v275_v59, %v273_v31 }
  0xa1   :  { %1264 = vsinq.f32 %v390_v29  ;;  %v480_v13 = vor.u32 %v479_v26, %v478_v62  ;;  %v483_v14 = vshll.u32 %v482_v8, 23  ;;  %v1638_v54 = vsel %vm281_vm8, %v282_v60, %v280_v47 }
  0xa2   :  { %v494_v15 = vsel %vm1597_vm9, 0, %v492_v41  ;;  %v1642_v12 = vshrl.u32 %v569_v10, 30  ;;  %v626_v16 = vsub.s32 32, %v625_v11  ;;  %v619_v59 = vor.u32 8388608, %v618_v0 }
  0xa3   :  { %v484_v17 = vor.u32 4788187, %v483_v14  ;;  %v487_v19 = vcvt.s32.f32 %v480_v13  ;;  %v1644_v2 = vand.u32 3, %v494_v15  ;;  %vm400_vm13 = vcmp.eq.s32.totalorder %v1626_v56, 2 }
  0xa4   :  { %v571_v22 = vshll.u32 %v1642_v12, 30  ;;  %v1648_v27 = vshrl.u32 %v623_v9, 5  ;;  %v628_v7 = vshll.u32 %v1333_v50, %v625_v11  ;;  %v631_v60 = vshll.u32 %v1334_v52, %v625_v11 }
  0xa5   :  { %vm397_vm14 = vcmp.eq.s32.totalorder %v1626_v56, 0  ;;  %v485_v33 = vand.u32 2147483647, %v484_v17  ;;  %v629_v28 = vshrl.u32 %v1334_v52, %v626_v16  ;;  %v632_v34 = vshrl.u32 %v1335_v55, %v626_v16 }
  0xa6   :  { %v634_v1 = vshll.u32 %v1335_v55, %v625_v11  ;;  %v1656_v37 = vsub.s32 %v568_v49, %v571_v22  ;;  %v635_v31 = vshrl.u32 %v1336_v57, %v626_v16  ;;  %v637_v38 = vshll.u32 %v1336_v57, %v625_v11 }
  0xa7   :  { %v638_v46 = vshrl.u32 %v1337_v63, %v626_v16  ;;  %v488_v47 = vmul.f32 %v487_v19, %v485_v33  ;;  %v564_v48 = vadd.s32 %v1582_v25, %v1589_v45  ;;  %v811_v32 = vadd.s32 3, %v391_v51 }
  0xa8   :  { %v915_v40 = vadd.s32 3, %v494_v15  ;;  %v574_v52 = vsub.s32 0, %v1656_v37  ;;  %v640_v53 = vshll.u32 %v1337_v63, %v625_v11  ;;  %v641_v55 = vshrl.u32 %v1338_v4, %v626_v16 }
  0xa9   :  { %v1666_v58 = vshll.u32 %v619_v59, 8  ;;  %vm396_vm15 = vcmp.lt.s32.totalorder %v1626_v56, 2  ;;  %v489_v61 = vxor.u32 2147483648, %v488_v47  ;;  %v627_v57 = vshrl.u32 %v1333_v50, %v626_v16 }
  0xaa   :  { %v630_v44 = vor.u32 %v629_v28, %v628_v7  ;;  %v633_v41 = vor.u32 %v632_v34, %v631_v60  ;;  %v1263_v5 = vpop.eup %1262  ;;  %v1205_v25 = vmin.u32 %v574_v52, %v1656_v37  ;;  %v636_v45 = vor.u32 %v635_v31, %v634_v1 }
  0xab   :  { %v639_v51 = vor.u32 %v638_v46, %v637_v38  ;;  %vm643_vm0 = vcmp.lt.s32.totalorder %v1648_v27, 1  ;;  %v1265_v62 = vpop.eup %1264  ;;  %v401_v63 = vxor.u32 2147483648, %v1263_v5  ;;  %v490_v4 = vsel %vm407_vm6, %v489_v61, %v488_v47 }
  0xac   :  { %vm644_vm1 = vcmp.lt.s32.totalorder %v1648_v27, 2  ;;  %vm645_vm2 = vcmp.lt.s32.totalorder %v1648_v27, 3  ;;  %v493_v50 = vsel %vm1597_vm9, %v1389_v23, %v490_v4  ;;  %v576_v21 = vclz %v1205_v25 }
  0xad   :  { %v642_v30 = vor.u32 %v641_v55, %v640_v53  ;;  %vm646_vm3 = vcmp.lt.s32.totalorder %v1648_v27, 4  ;;  %v398_v35 = vxor.u32 2147483648, %v1265_v62  ;;  %1266 = vcosq.f32 %v493_v50 }
  0xae   :  { %v647_v49 = vsel %vm643_vm0, %v627_v57, %v630_v44  ;;  %v648_v0 = vsel %vm646_vm3, %v636_v45, 2102212464  ;;  %vm394_vm4 = vweird.f32 %v1385_v18  ;;  %1268 = vsinq.f32 %v493_v50 }
  0xaf   :  { %v1206_v29 = vadd.s32 4294967294, %v576_v21  ;;  %v649_v6 = vsel %vm645_vm2, %v633_v41, %v648_v0  ;;  %v651_v26 = vsel %vm643_vm0, %v630_v44, %v633_v41  ;;  %v402_v8 = vsel %vm400_vm13, %v401_v63, %v1265_v62 }
  0xb0   :  { %v652_v9 = vsel %vm646_vm3, %v639_v51, 920167782  ;;  %v655_v10 = vsel %vm643_vm0, %v633_v41, %v636_v45  ;;  %v812_v11 = vand.u32 3, %v811_v32  ;;  %v399_v13 = vsel %vm397_vm14, %v1263_v5, %v398_v35 }
  0xb1   :  { %vm500_vm5 = vcmp.eq.s32.totalorder %v1644_v2, 0  ;;  %vm1207_vm6 = vcmp.lt.s32.totalorder %v1206_v29, 0  ;;  %v653_v14 = vsel %vm645_vm2, %v636_v45, %v652_v9  ;;  %v656_v15 = vsel %vm646_vm3, %v642_v30, 1326507024 }
  0xb2   :  { %vm499_vm7 = vcmp.lt.s32.totalorder %v1644_v2, 2  ;;  %v579_v16 = vsel %vm1207_vm6, 0, %v1206_v29  ;;  %v650_v17 = vsel %vm644_vm1, %v647_v49, %v649_v6  ;;  %v654_v19 = vsel %vm644_vm1, %v651_v26, %v653_v14 }
  0xb3   :  { %v657_v59 = vsel %vm645_vm2, %v639_v51, %v656_v15  ;;  %vm497_vm8 = vweird.f32 %v1389_v23  ;;  %v580_v22 = vsub.s32 32, %v579_v16  ;;  %v581_v7 = vshll.u32 %v1656_v37, %v579_v16 }
  0xb4   :  { %v584_v60 = vsub.s32 4294967266, %v579_v16  ;;  %v658_v33 = vsel %vm644_vm1, %v655_v10, %v657_v59  ;;  %v1718_v1 = vmul.u32.u64.low %v1666_v58, %v654_v19  ;;  %v1719_v31 = vmul.u32.u64.high %v1666_v58, %v654_v19, %v1718_v1 }
  0xb5   :  { %v1714_v28 = vmul.u32.u64.low %v1666_v58, %v658_v33  ;;  %v1715_v34 = vmul.u32.u64.high %v1666_v58, %v658_v33, %v1714_v28  ;;  %v403_v38 = vsel %vm396_vm15, %v399_v13, %v402_v8  ;;  %v582_v46 = vshrl.u32 %v564_v48, %v580_v22 }
  0xb6   :  { %v585_v47 = vadd.s32 127, %v584_v60  ;;  %v666_v37 = vmul.u32 %v1666_v58, %v650_v17  ;;  %vm813_vm9 = vcmp.lt.s32.totalorder %v812_v11, 2  ;;  %vm814_vm10 = vcmp.eq.s32.totalorder %v812_v11, 0 }
  0xb7   :  { %vm817_vm11 = vcmp.eq.s32.totalorder %v812_v11, 2  ;;  %v916_v27 = vand.u32 3, %v915_v40  ;;  %v583_v32 = vor.u32 %v582_v46, %v581_v7  ;;  %v816_v53 = vsel %vm814_vm10, %v1263_v5, %v398_v35  ;;  %v1267_v61 = vpop.eup %1266 }
  0xb8   :  { %v586_v52 = vshll.u32 %v585_v47, 23  ;;  %v819_v55 = vsel %vm817_vm11, %v401_v63, %v1265_v62  ;;  %v404_v57 = vsel %vm394_vm4, nan, %v403_v38  ;;  %vm503_vm12 = vcmp.eq.s32.totalorder %v1644_v2, 2  ;;  %v1269_v48 = vpop.eup %1268  ;;  %v1163_v38 = vld [vmem:[#allocation4] sm:$0xff] }
  0xb9   :  { %vm668_vm13 = vc.u32 %v1715_v34, %v1718_v1  ;;  %v669_v56 = vadd.s32 1, %v1719_v31  ;;  %v504_v58 = vxor.u32 2147483648, %v1267_v61  ;;  %v590_v41 = vcvt.s32.f32 %v583_v32 }
  0xba   :  { %v587_v44 = vor.u32 4788187, %v586_v52  ;;  %v820_v40 = vsel %vm813_vm9, %v816_v53, %v819_v55  ;;  %v501_v25 = vxor.u32 2147483648, %v1269_v48  ;;  %vm917_vm14 = vcmp.lt.s32.totalorder %v916_v27, 2 }
  0xbb   :  { %v670_v5 = vsel %vm668_vm13, %v669_v56, %v1719_v31  ;;  %vm918_vm15 = vcmp.eq.s32.totalorder %v916_v27, 0  ;;  %v505_v45 = vsel %vm503_vm12, %v504_v58, %v1269_v48  ;;  %vm921_vm0 = vcmp.eq.s32.totalorder %v916_v27, 2 }
  0xbc   :  { %v588_v51 = vand.u32 2147483647, %v587_v44  ;;  %v671_v62 = vadd.s32 %v670_v5, %v666_v37  ;;  %v502_v63 = vsel %vm500_vm5, %v1267_v61, %v501_v25  ;;  %v821_v4 = vsel %vm394_vm4, nan, %v820_v40 }
  0xbd   :  { %v920_v50 = vsel %vm918_vm15, %v1267_v61, %v501_v25  ;;  %v923_v21 = vsel %vm921_vm0, %v504_v58, %v1269_v48  ;;  %v506_v30 = vsel %vm499_vm7, %v502_v63, %v505_v45  ;;  %v253_v26 = vsub.f32 2.0, %v1488_v42 }
  0xbe   :  { %v591_v35 = vmul.f32 %v590_v41, %v588_v51  ;;  %v672_v49 = vadd.s32 536870912, %v671_v62  ;;  %v924_v0 = vsel %vm917_vm14, %v920_v50, %v923_v21  ;;  %v507_v29 = vsel %vm497_vm8, nan, %v506_v30 }
  0xbf   :  { %v925_v6 = vsel %vm497_vm8, nan, %v924_v0  ;;  %v714_v18 = vmul.f32 %v404_v57, %v1632_v3  ;;  %v715_v9 = vmul.f32 %v507_v29, %v1638_v54  ;;  %v1134_v2 = vmul.f32 %v821_v4, %v1632_v3 }
  0xc0   :  { %v1744_v8 = vshrl.u32 %v672_v49, 30  ;;  %v1135_v10 = vmul.f32 %v925_v6, %v1638_v54  ;;  %v592_v11 = vxor.u32 2147483648, %v591_v35  ;;  %vm1150_vm1 = vcmask 1041408  }
  0xc1   :  { %vm510_vm2 = vcmp.lt.s32.totalorder %v1403_v43, 0  ;;  %v1142_v23 = vrot.slane %v1134_v2, 6  ;;  %1270 = vlog2.f32 %v253_v26  ;;  %vm1756_vm3 = vcmp.le.f32.partialorder %v508_v24, 0.7853982 }
  0xc2   :  { %v674_v13 = vshll.u32 %v1744_v8, 30  ;;  %v1143_v14 = vrot.slane %v1135_v10, 6  ;;  %v593_v54 = vsel %vm510_vm2, %v592_v11, %v591_v35  ;;  %v263_v59 = vmul.f32 0.6931472, %v1532_v36 }
  0xc3   :  { %v1151_v15 = vsel %vm1150_vm1, %v714_v18, %v1142_v23  ;;  %v594_v60 = vsub.s32 4, %v1642_v12  ;;  %v596_v33 = vsel %vm1756_vm3, %v1403_v43, %v593_v54  ;;  %v667_v52 = vadd.s32 %v1718_v1, %v1715_v34 }
  0xc4   :  { %v675_v42 = vsub.s32 %v671_v62, %v674_v13  ;;  %v1152_v16 = vsel %vm1150_vm1, %v715_v9, %v1143_v14  ;;  %v1155_v19 = vmul.f32 0.35355338, %v1151_v15  ;;  %v1767_v46 = vmul.f32 -2.0, %v263_v59 }
  0xc5   :  { %v1156_v22 = vmul.f32 0.35355338, %v1152_v16  ;;  %1272 = vcosq.f32 %v596_v33  ;;  %v595_v36 = vsel %vm510_vm2, %v594_v60, %v1642_v12  ;;  %v697_v63 = vsub.s32 4, %v1744_v8 }
  0xc6   :  { %v677_v17 = vsub.s32 0, %v675_v42  ;;  %v1159_v28 = vadd.f32 1.0, %v1155_v19  ;;  %1274 = vsinq.f32 %v596_v33  ;;  %v597_v55 = vsel %vm1756_vm3, 0, %v595_v36 }
  0xc7   :  { %v1160_v24 = vadd.f32 1.0, %v1156_v22  ;;  %1276 = vrsqrt.f32 %v1767_v46  ;;  %v1019_v44 = vadd.s32 3, %v597_v55  ;;  %v601_v35 = vand.u32 3, %v597_v55 }
  0xc8   :  { %v1209_v7 = vmin.u32 %v677_v17, %v675_v42  ;;  %vm613_vm5 = vcmp.lt.s32.totalorder %v1493_v39, 0  ;;  %vm612_vm8 = vcmp.le.f32.partialorder %v611_v20, 0.7853982  ;;  %vm286_vm9 = vcmp.eq.f32.partialorder %v1767_v46, inf }
  0xc9   :  { %v1169_v47 = vcombine.low %v1159_v28, %v1160_v24  ;;  %v1020_v51 = vand.u32 3, %v1019_v44  ;;  %v698_v0 = vsel %vm613_vm5, %v697_v63, %v1744_v8  ;;  %vm603_vm11 = vcmp.eq.s32.totalorder %v601_v35, 0 }
  0xca   :  { %v679_v31 = vclz %v1209_v7  ;;  %vm606_vm12 = vcmp.eq.s32.totalorder %v601_v35, 2  ;;  %v700_v2 = vsel %vm612_vm8, 0, %v698_v0  ;;  %vm288_vm13 = vcmp.eq.f32.partialorder %v1767_v46, 0.0 }
  0xcb   :  { %v1173_v27 = vmul.f32 %v1169_v47, %v1163_v38  ;;  %v1271_v32 = vpop.eup %1270  ;;  %vm1022_vm6 = vcmp.eq.s32.totalorder %v1020_v51, 0  ;;  %vm1025_vm7 = vcmp.eq.s32.totalorder %v1020_v51, 2  ;;  %vm1021_vm10 = vcmp.lt.s32.totalorder %v1020_v51, 2 }
  0xcc   :  { %v1210_v37 = vadd.s32 4294967294, %v679_v31  ;;  %v265_v48 = vmul.f32 0.6931472, %v1271_v32  ;;  %v289_v20 = vand.u32 2147483648, %v1767_v46  ;;  %vm600_vm14 = vweird.f32 %v1403_v43 }
  0xcd   :  { %1175 = vst [vmem:[#allocation7] sm:$0xff] %v1173_v27  ;;  %vm602_vm15 = vcmp.lt.s32.totalorder %v601_v35, 2  ;;  %v1123_v23 = vadd.s32 3, %v700_v2  ;;  %v704_v54 = vand.u32 3, %v700_v2 }
  0xce   :  { %vm1211_vm4 = vcmp.lt.s32.totalorder %v1210_v37, 0  ;;  %v1777_v25 = vmul.f32 -2.0, %v265_v48 }
  0xcf   :  { %v682_v53 = vsel %vm1211_vm4, 0, %v1210_v37  ;;  %v1273_v34 = vpop.eup %1272  ;;  %v1124_v17 = vand.u32 3, %v1123_v23  ;;  %vm706_vm3 = vcmp.eq.s32.totalorder %v704_v54, 0  ;;  %vm709_vm4 = vcmp.eq.s32.totalorder %v704_v54, 2 }
  0xd0   :  { %v683_v61 = vsub.s32 32, %v682_v53  ;;  %v684_v57 = vshll.u32 %v675_v42, %v682_v53  ;;  %v687_v56 = vsub.s32 4294967266, %v682_v53  ;;  %v1275_v45 = vpop.eup %1274  ;;  %1278 = vrsqrt.f32 %v1777_v25 }
  0xd1   :  { %v1277_v4 = vpop.eup %1276  ;;  %v604_v50 = vxor.u32 2147483648, %v1275_v45  ;;  %v607_v21 = vxor.u32 2147483648, %v1273_v34  ;;  %vm293_vm0 = vcmp.eq.f32.partialorder %v1777_v25, inf  ;;  %vm295_vm2 = vcmp.eq.f32.partialorder %v1777_v25, 0.0 }
  0xd2   :  { %v685_v58 = vshrl.u32 %v667_v52, %v683_v61  ;;  %v688_v12 = vadd.s32 127, %v687_v56  ;;  %v285_v29 = vmul.f32 %v1277_v4, %v1767_v46  ;;  %v296_v22 = vand.u32 2147483648, %v1777_v25 }
  0xd3   :  { %v1024_v26 = vsel %vm1022_vm6, %v1273_v34, %v604_v50  ;;  %v1027_v18 = vsel %vm1025_vm7, %v607_v21, %v1275_v45  ;;  %v605_v11 = vsel %vm603_vm11, %v1273_v34, %v604_v50  ;;  %v608_v13 = vsel %vm606_vm12, %v607_v21, %v1275_v45 }
  0xd4   :  { %v686_v41 = vor.u32 %v685_v58, %v684_v57  ;;  %v689_v40 = vshll.u32 %v688_v12, 23  ;;  %v287_v8 = vsel %vm286_vm9, %v1767_v46, %v285_v29  ;;  %v1028_v10 = vsel %vm1021_vm10, %v1024_v26, %v1027_v18 }
  0xd5   :  { %v290_v42 = vsel %vm288_vm13, %v289_v20, %v287_v8  ;;  %v1029_v15 = vsel %vm600_vm14, nan, %v1028_v10  ;;  %v609_v16 = vsel %vm602_vm15, %v605_v11, %v608_v13  ;;  %vm1126_vm6 = vcmp.eq.s32.totalorder %v1124_v17, 0 }
  0xd6   :  { %v690_v1 = vor.u32 4788187, %v689_v40  ;;  %v693_v5 = vcvt.s32.f32 %v686_v41  ;;  %v1136_v19 = vmul.f32 %v1029_v15, %v290_v42  ;;  %v610_v59 = vsel %vm600_vm14, nan, %v609_v16  ;;  %v1164_v41 = vld [vmem:[#allocation4 + $0x8] sm:$0xff] }
  0xd7   :  { %v716_v24 = vmul.f32 %v610_v59, %v290_v42  ;;  %vm705_vm7 = vcmp.lt.s32.totalorder %v704_v54, 2  ;;  %vm703_vm9 = vweird.f32 %v1493_v39 }
  0xd8   :  { %v691_v62 = vand.u32 2147483647, %v690_v1  ;;  %v1144_v31 = vrot.slane %v1136_v19, 6 }
  0xda   :  { %v694_v30 = vmul.f32 %v693_v5, %v691_v62  ;;  %v1279_v14 = vpop.eup %1278  ;;  %v1153_v52 = vsel %vm1150_vm1, %v716_v24, %v1144_v31 }
  0xdb   :  { %v292_v3 = vmul.f32 %v1279_v14, %v1777_v25  ;;  %v1157_v56 = vmul.f32 0.35355338, %v1153_v52 }
  0xdc   :  { %v695_v49 = vxor.u32 2147483648, %v694_v30 }
  0xdd   :  { %v294_v60 = vsel %vm293_vm0, %v1777_v25, %v292_v3  ;;  %v1161_v12 = vadd.f32 1.0, %v1157_v56 }
  0xde   :  { %v696_v6 = vsel %vm613_vm5, %v695_v49, %v694_v30  ;;  %vm1129_vm5 = vcmp.eq.s32.totalorder %v1124_v17, 2  ;;  %v297_v47 = vsel %vm295_vm2, %v296_v22, %v294_v60 }
  0xdf   :  { %v699_v9 = vsel %vm612_vm8, %v1493_v39, %v696_v6  ;;  %vm1125_vm8 = vcmp.lt.s32.totalorder %v1124_v17, 2 }
  0xe0   :  { %1280 = vcosq.f32 %v699_v9 }
  0xe1   :  { %1282 = vsinq.f32 %v699_v9 }
  0xea   :  { %v1281_v7 = vpop.eup %1280 }
  0xeb   :  { %v1283_v33 = vpop.eup %1282  ;;  %v710_v28 = vxor.u32 2147483648, %v1281_v7 }
  0xec   :  { %v707_v38 = vxor.u32 2147483648, %v1283_v33 }
  0xed   :  { %v711_v43 = vsel %vm709_vm4, %v710_v28, %v1283_v33  ;;  %v1131_v46 = vsel %vm1129_vm5, %v710_v28, %v1283_v33 }
  0xee   :  { %v708_v37 = vsel %vm706_vm3, %v1281_v7, %v707_v38  ;;  %v1128_v36 = vsel %vm1126_vm6, %v1281_v7, %v707_v38 }
  0xef   :  { %v712_v27 = vsel %vm705_vm7, %v708_v37, %v711_v43  ;;  %v1132_v32 = vsel %vm1125_vm8, %v1128_v36, %v1131_v46 }
  0xf0   :  { %v713_v53 = vsel %vm703_vm9, nan, %v712_v27  ;;  %v1133_v55 = vsel %vm703_vm9, nan, %v1132_v32 }
  0xf1   :  { %v717_v61 = vmul.f32 %v713_v53, %v297_v47  ;;  %v1137_v57 = vmul.f32 %v1133_v55, %v297_v47 }
  0xf3   :  { %v1145_v48 = vrot.slane %v1137_v57, 6 }
  0xf5   :  { %v1154_v58 = vsel %vm1150_vm1, %v717_v61, %v1145_v48 }
  0xf6   :  { %v1158_v39 = vmul.f32 0.35355338, %v1154_v58 }
  0xf8   :  { %v1162_v44 = vadd.f32 1.0, %v1158_v39 }
  0xfa   :  { %v1170_v40 = vcombine.low %v1161_v12, %v1162_v44 }
  0xfc   :  { %v1174_v25 = vmul.f32 %v1170_v40, %v1164_v41 }
  0xfe   :  { %1176 = vst [vmem:[#allocation7 + $0x8] sm:$0xff] %v1174_v25 }
  0xff   :  { %1317 = shalt.err (!%p1314_p12)
}
 0x100   :  { %s1318_s26 = scalar_lea.hbm %s1820_s2, 256 }
 0x101   :  { %p1319_p13 = scmp.ne.s32.totalorder %s1820_s2, %s1318_s26  ;;  %p1322_p0 = scmp.lt.u32.totalorder %s1318_s26, %s1820_s2 }
 0x103   :  { %p1324_p1 = pnand %p1322_p0, %p1319_p13 }
 0x105   :  { %1327 = shalt.err (!%p1324_p1)
}
 0x106   :  { %1186 = dma.vmem_to_hbm [thread:$0]  %s1184_s1, 256, %s1820_s2, [#allocation6]  }
 0x107   :  { %1330 = dma.done.wait [#allocation6], 256  }
 0x108   :  { %1331 = vsyncadd [#allocation6], 4294967040 }
 0x109   :  { %1190 = vsyncpa [#allocation5], 1 }
 0x10a   :  { %1191 = vsyncpa [#allocation6], 1 }

</bundles_post_ra>
